<compile_context>
chip_gen: v5e
topology: v5e:2x2
jax: 0.10.0
libtpu: 0.0.40
codegen_flags: <defaults>
</compile_context>

<pallas_src>
import functools

import jax
import jax.numpy as jnp
from jax.experimental import pallas as pl
from jax.experimental.pallas import tpu as pltpu

_CHUNK = 128    # rows per inner compute chunk == lane width of the output slab
_TM_CAP = 4096  # max batch rows per grid step (DMA tile)


def critic_kernel(s_ref, a_ref, w1s_ref, w1a_ref, b1_ref, w2_ref, b2_ref,
                  w3r_ref, b3_ref, o_ref):
    """One grid step: `cpt` chunks of _CHUNK batch rows each.

    Block shapes:
      s_ref : (cpt, _CHUNK, S)    a_ref : (cpt, _CHUNK, A)
      o_ref : (cpt, 1, _CHUNK)    -- lane-dense output rows
      weights/biases: full arrays, VMEM-resident across the grid.
    """
    nchunks = o_ref.shape[0]

    # Hoist the (tiny) weight/bias loads out of the chunk loop.
    w1s = w1s_ref[...]                       # (S, H)  compute dtype
    w1a = w1a_ref[...]                       # (A, H)
    b1 = b1_ref[...]                         # (1, H)  f32
    w2 = w2_ref[...]                         # (H, H)
    b2 = b2_ref[...]                         # (1, H)  f32
    w3 = w3r_ref[...]                        # (1, H)
    b3 = b3_ref[...]                         # (1, 1)  f32

    def body(c, carry):
        s = s_ref[c]                         # (_CHUNK, S)
        a = a_ref[c]                         # (_CHUNK, A)
        # fc1 with the concat fused: [C,S]@[S,H] + [C,A]@[A,H], f32 accumulate.
        h1 = (jnp.dot(s, w1s, preferred_element_type=jnp.float32)
              + jnp.dot(a, w1a, preferred_element_type=jnp.float32)
              + b1)
        h1 = jnp.maximum(h1, 0.0)
        # fc2: cast activations to the (possibly bf16) weight dtype for the
        # MXU, accumulate in f32, bias + ReLU in f32.
        h2 = (jnp.dot(h1.astype(w2.dtype), w2,
                      preferred_element_type=jnp.float32)
              + b2)
        h2 = jnp.maximum(h2, 0.0)
        # fc3 (out_features == 1) on the MXU, contracting H of both operands:
        # (1,H) x (C,H)^T -> (1,C).  The result is born lane-major, so the
        # store is a single unmasked lane-dense row (no sublane->lane relayout,
        # no masked single-lane vst).
        r = jax.lax.dot_general(w3, h2.astype(w3.dtype),
                                dimension_numbers=(((1,), (1,)), ((), ())),
                                preferred_element_type=jnp.float32)
        o_ref[c] = r + b3                    # (1, _CHUNK)
        return carry

    jax.lax.fori_loop(0, nchunks, body, 0)


def _round_up(x, m):
    return ((x + m - 1) // m) * m


@functools.partial(jax.jit, static_argnames=("compute_dtype", "use_pallas"))
def critic_forward(state, action, params, compute_dtype=jnp.float32,
                   use_pallas=None):
    """Fused Critic forward pass as a single batch-tiled Pallas call."""
    w1, b1, w2, b2, w3, b3 = params
    B, S = state.shape
    A = action.shape[1]
    H = w1.shape[1]

    if use_pallas is None:
        # Below one lane-dense chunk the Pallas call is pure launch/step
        # overhead; plain XLA fusion is already optimal there.
        use_pallas = B >= _CHUNK
    if not use_pallas:
        x = jnp.concatenate([state, action], axis=-1).astype(jnp.float32)
        h1 = jnp.maximum(x @ w1 + b1, 0.0)
        h2 = jnp.maximum(h1 @ w2 + b2, 0.0)
        return h2 @ w3 + b3

    # Split fc1's weight for the fused concat; expose w3 as a [1, H] row.
    w1_s = w1[:S].astype(compute_dtype)
    w1_a = w1[S:].astype(compute_dtype)
    w2_c = w2.astype(compute_dtype)
    w3_row = w3.reshape(1, H).astype(compute_dtype)
    b1_f = b1.reshape(1, H).astype(jnp.float32)
    b2_f = b2.reshape(1, H).astype(jnp.float32)
    b3_f = b3.reshape(1, 1).astype(jnp.float32)

    # --- Tile selection -----------------------------------------------------
    # Rows are padded to a multiple of _CHUNK; the grid tile TM is a multiple
    # of _CHUNK, capped at _TM_CAP, and chosen so there are >= 2 tiles whenever
    # the batch allows it (v7x megacore).
    pB = _round_up(B, _CHUNK)
    tm = min(_TM_CAP, _round_up(-(-pB // 2), _CHUNK))
    pB = _round_up(pB, tm)
    ntiles = pB // tm
    cpt = tm // _CHUNK           # chunks per grid step
    nrows = pB // _CHUNK         # total chunk-rows

    s = state.astype(compute_dtype)
    a = action.astype(compute_dtype)
    if pB != B:
        pad = pB - B
        s = jnp.pad(s, ((0, pad), (0, 0)))
        a = jnp.pad(a, ((0, pad), (0, 0)))
    # Present inputs as (rows/_CHUNK, _CHUNK, feat): all in-kernel dynamic
    # indexing is then on the leading (untiled) axis.  Row-major reshape, so
    # no data movement.
    s3 = s.reshape(nrows, _CHUNK, S)
    a3 = a.reshape(nrows, _CHUNK, A)

    def resident(arr):
        return pl.BlockSpec(arr.shape, lambda i: (0,) * arr.ndim)

    itemsize = jnp.dtype(compute_dtype).itemsize
    cost = pl.CostEstimate(
        flops=2 * pB * ((S + A) * H + H * H + H),
        transcendentals=0,
        bytes_accessed=(pB * (S + A) * itemsize          # state + action in
                        + pB * 4                         # f32 output
                        + ((S + A) * H + H * H + H) * itemsize  # weights
                        + (2 * H + 1) * 4),              # biases
    )

    out = pl.pallas_call(
        critic_kernel,
        out_shape=jax.ShapeDtypeStruct((nrows, 1, _CHUNK), jnp.float32),
        grid=(ntiles,),
        in_specs=[
            pl.BlockSpec((cpt, _CHUNK, S), lambda i: (i, 0, 0)),   # state
            pl.BlockSpec((cpt, _CHUNK, A), lambda i: (i, 0, 0)),   # action
            resident(w1_s), resident(w1_a), resident(b1_f),
            resident(w2_c), resident(b2_f),
            resident(w3_row), resident(b3_f),
        ],
        out_specs=pl.BlockSpec((cpt, 1, _CHUNK), lambda i: (i, 0, 0)),
        compiler_params=pltpu.CompilerParams(
            dimension_semantics=("parallel",),
            # Double-buffered, lane-padded (TM,128) input tiles are ~8 MiB at
            # TM=4096 f32; 32 MiB gives ample headroom on every generation
            # (explicitly above v5e's 16 MiB default, at the v6e/v7x default,
            # well under v7x's 64 MiB physical VMEM).
            vmem_limit_bytes=32 * 1024 * 1024,
        ),
        cost_estimate=cost,
    )(s3, a3, w1_s, w1_a, b1_f, w2_c, b2_f, w3_row, b3_f)

    # (rows/_CHUNK, 1, _CHUNK) row-major == padded batch order.
    return out.reshape(pB, 1)[:B]


def init_critic_params(key, state_size, action_size, hidden_size=32):
    """Deterministic PyTorch-style (uniform +-1/sqrt(fan_in)) initialization."""
    def linear(k, fan_in, fan_out):
        kw, kb = jax.random.split(k)
        bound = 1.0 / jnp.sqrt(float(fan_in))
        w = jax.random.uniform(kw, (fan_in, fan_out), jnp.float32, -bound, bound)
        b = jax.random.uniform(kb, (1, fan_out), jnp.float32, -bound, bound)
        return w, b

    k1, k2, k3 = jax.random.split(key, 3)
    w1, b1 = linear(k1, state_size + action_size, hidden_size)
    w2, b2 = linear(k2, hidden_size, hidden_size)
    w3, b3 = linear(k3, hidden_size, 1)
    return (w1, b1, w2, b2, w3, b3)


def critic_reference(state, action, params):
    """Plain-JAX f32 reference for correctness checking."""
    w1, b1, w2, b2, w3, b3 = params
    x = jnp.concatenate([state, action], axis=-1).astype(jnp.float32)
    h1 = jnp.maximum(x @ w1 + b1, 0.0)
    h2 = jnp.maximum(h1 @ w2 + b2, 0.0)
    return h2 @ w3 + b3


if __name__ == "__main__":
    key = jax.random.PRNGKey(0)
    k_params, k_state, k_action = jax.random.split(key, 3)

    batch, state_size, action_size, hidden_size = 8, 8, 4, 32
    params = init_critic_params(k_params, state_size, action_size, hidden_size)
    state = jax.random.normal(k_state, (batch, state_size), jnp.float32)
    action = jax.random.normal(k_action, (batch, action_size), jnp.float32)
    ref = critic_reference(state, action, params)

    # Small batch forced through the Pallas kernel (single tile, f32 path).
    out_small = jax.block_until_ready(
        critic_forward(state, action, params, compute_dtype=jnp.float32,
                       use_pallas=True))
    assert out_small.shape == (batch, 1), out_small.shape
    assert jnp.allclose(out_small, ref, atol=1e-5, rtol=1e-5), (out_small, ref)

    # Default path for a tiny batch takes the plain-JAX bypass.
    out_bypass = jax.block_until_ready(critic_forward(state, action, params))
    assert jnp.allclose(out_bypass, ref, atol=1e-5, rtol=1e-5)

    # Larger, non-tile-aligned batch: multi-tile grid (>=2 tiles for megacore),
    # padding path, lane-dense output slab.
    big_B = 1000
    kbs, kba = jax.random.split(jax.random.PRNGKey(1))
    big_state = jax.random.normal(kbs, (big_B, state_size), jnp.float32)
    big_action = jax.random.normal(kba, (big_B, action_size), jnp.float32)
    big_ref = critic_reference(big_state, big_action, params)
    big_out = jax.block_until_ready(
        critic_forward(big_state, big_action, params))
    assert big_out.shape == (big_B, 1), big_out.shape
    assert jnp.allclose(big_out, big_ref, atol=1e-4, rtol=1e-4)

    # bf16-matmul / f32-accumulate path (loose tolerance vs f32 reference).
    big_out_bf16 = jax.block_until_ready(
        critic_forward(big_state, big_action, params,
                       compute_dtype=jnp.bfloat16))
    assert big_out_bf16.shape == (big_B, 1), big_out_bf16.shape
    assert jnp.allclose(big_out_bf16, big_ref, atol=5e-2, rtol=5e-2)

    print("KERNEL_OK")
</pallas_src>

<mosaic_0001>
module attributes {stable_mosaic.version = 11 : i64} {
  func.func @critic_kernel(%arg0: i32, %arg1: memref<1x128x8xf32, #tpu.memory_space<vmem>>, %arg2: memref<1x128x4xf32, #tpu.memory_space<vmem>>, %arg3: memref<8x32xf32, #tpu.memory_space<vmem>>, %arg4: memref<4x32xf32, #tpu.memory_space<vmem>>, %arg5: memref<1x32xf32, #tpu.memory_space<vmem>>, %arg6: memref<32x32xf32, #tpu.memory_space<vmem>>, %arg7: memref<1x32xf32, #tpu.memory_space<vmem>>, %arg8: memref<1x32xf32, #tpu.memory_space<vmem>>, %arg9: memref<1x1xf32, #tpu.memory_space<vmem>>, %arg10: memref<1x1x128xf32, #tpu.memory_space<vmem>>) attributes {dimension_semantics = [#tpu.dimension_semantics<parallel>], iteration_bounds = array<i64: 1>, scalar_prefetch = 0 : i64, scratch_operands = 0 : i64, tpu.core_type = #tpu.core_type<tc>, window_params = [{transform_indices = @transform_0, window_bounds = array<i64: 1, 128, 8>}, {transform_indices = @transform_1, window_bounds = array<i64: 1, 128, 4>}, {pipeline_mode = #tpu.pipeline_mode<synchronous>, transform_indices = @transform_2, window_bounds = array<i64: 8, 32>}, {pipeline_mode = #tpu.pipeline_mode<synchronous>, transform_indices = @transform_3, window_bounds = array<i64: 4, 32>}, {pipeline_mode = #tpu.pipeline_mode<synchronous>, transform_indices = @transform_4, window_bounds = array<i64: 1, 32>}, {pipeline_mode = #tpu.pipeline_mode<synchronous>, transform_indices = @transform_5, window_bounds = array<i64: 32, 32>}, {pipeline_mode = #tpu.pipeline_mode<synchronous>, transform_indices = @transform_6, window_bounds = array<i64: 1, 32>}, {pipeline_mode = #tpu.pipeline_mode<synchronous>, transform_indices = @transform_7, window_bounds = array<i64: 1, 32>}, {pipeline_mode = #tpu.pipeline_mode<synchronous>, transform_indices = @transform_8, window_bounds = array<i64: 1, 1>}, {transform_indices = @transform_9, window_bounds = array<i64: 1, 1, 128>}]} {
    %c0 = arith.constant 0 : index
    %c0_0 = arith.constant 0 : index
    %0 = vector.load %arg3[%c0, %c0_0] : memref<8x32xf32, #tpu.memory_space<vmem>>, vector<8x32xf32>
    %c0_1 = arith.constant 0 : index
    %c0_2 = arith.constant 0 : index
    %1 = vector.load %arg4[%c0_1, %c0_2] : memref<4x32xf32, #tpu.memory_space<vmem>>, vector<4x32xf32>
    %c0_3 = arith.constant 0 : index
    %c0_4 = arith.constant 0 : index
    %2 = vector.load %arg5[%c0_3, %c0_4] : memref<1x32xf32, #tpu.memory_space<vmem>>, vector<1x32xf32>
    %c0_5 = arith.constant 0 : index
    %c0_6 = arith.constant 0 : index
    %3 = vector.load %arg6[%c0_5, %c0_6] : memref<32x32xf32, #tpu.memory_space<vmem>>, vector<32x32xf32>
    %c0_7 = arith.constant 0 : index
    %c0_8 = arith.constant 0 : index
    %4 = vector.load %arg7[%c0_7, %c0_8] : memref<1x32xf32, #tpu.memory_space<vmem>>, vector<1x32xf32>
    %c0_9 = arith.constant 0 : index
    %c0_10 = arith.constant 0 : index
    %5 = vector.load %arg8[%c0_9, %c0_10] : memref<1x32xf32, #tpu.memory_space<vmem>>, vector<1x32xf32>
    %c0_11 = arith.constant 0 : index
    %c0_12 = arith.constant 0 : index
    %6 = vector.load %arg9[%c0_11, %c0_12] : memref<1x1xf32, #tpu.memory_space<vmem>>, vector<1x1xf32>
    %c0_i32 = arith.constant 0 : i32
    %7 = arith.index_cast %c0_i32 : i32 to index
    %c0_13 = arith.constant 0 : index
    %c0_14 = arith.constant 0 : index
    %8 = vector.load %arg1[%7, %c0_13, %c0_14] : memref<1x128x8xf32, #tpu.memory_space<vmem>>, vector<1x128x8xf32>
    %9 = vector.shape_cast %8 : vector<1x128x8xf32> to vector<128x8xf32>
    %10 = arith.index_cast %c0_i32 : i32 to index
    %c0_15 = arith.constant 0 : index
    %c0_16 = arith.constant 0 : index
    %11 = vector.load %arg2[%10, %c0_15, %c0_16] : memref<1x128x4xf32, #tpu.memory_space<vmem>>, vector<1x128x4xf32>
    %12 = vector.shape_cast %11 : vector<1x128x4xf32> to vector<128x4xf32>
    %cst = arith.constant dense<0.000000e+00> : vector<128x32xf32>
    %13 = tpu.matmul %9, %0, %cst {dimension_numbers = #tpu.dot_dimension_numbers<[1], [0], [0], [1], [0, 0, 1, 1], [], []>} : vector<128x8xf32>, vector<8x32xf32>, vector<128x32xf32> -> vector<128x32xf32>
    %cst_17 = arith.constant dense<0.000000e+00> : vector<128x32xf32>
    %14 = tpu.matmul %12, %1, %cst_17 {dimension_numbers = #tpu.dot_dimension_numbers<[1], [0], [0], [1], [0, 0, 1, 1], [], []>} : vector<128x4xf32>, vector<4x32xf32>, vector<128x32xf32> -> vector<128x32xf32>
    %15 = arith.addf %13, %14 : vector<128x32xf32>
    %16 = vector.broadcast %2 : vector<1x32xf32> to vector<128x32xf32>
    %17 = arith.addf %15, %16 : vector<128x32xf32>
    %cst_18 = arith.constant 0.000000e+00 : f32
    %18 = vector.broadcast %cst_18 : f32 to vector<128x32xf32>
    %19 = arith.maximumf %17, %18 : vector<128x32xf32>
    %cst_19 = arith.constant dense<0.000000e+00> : vector<128x32xf32>
    %20 = tpu.matmul %19, %3, %cst_19 {dimension_numbers = #tpu.dot_dimension_numbers<[1], [0], [0], [1], [0, 0, 1, 1], [], []>} : vector<128x32xf32>, vector<32x32xf32>, vector<128x32xf32> -> vector<128x32xf32>
    %21 = vector.broadcast %4 : vector<1x32xf32> to vector<128x32xf32>
    %22 = arith.addf %20, %21 : vector<128x32xf32>
    %cst_20 = arith.constant 0.000000e+00 : f32
    %23 = vector.broadcast %cst_20 : f32 to vector<128x32xf32>
    %24 = arith.maximumf %22, %23 : vector<128x32xf32>
    %cst_21 = arith.constant dense<0.000000e+00> : vector<1x128xf32>
    %25 = tpu.matmul %5, %24, %cst_21 {dimension_numbers = #tpu.dot_dimension_numbers<[1], [1], [0], [0], [0, 0, 1, 0], [], []>} : vector<1x32xf32>, vector<128x32xf32>, vector<1x128xf32> -> vector<1x128xf32>
    %26 = vector.broadcast %6 : vector<1x1xf32> to vector<1x128xf32>
    %27 = arith.addf %25, %26 : vector<1x128xf32>
    %28 = arith.index_cast %c0_i32 : i32 to index
    %c0_22 = arith.constant 0 : index
    %c0_23 = arith.constant 0 : index
    %29 = vector.load %arg10[%28, %c0_22, %c0_23] : memref<1x1x128xf32, #tpu.memory_space<vmem>>, vector<1x1x128xf32>
    %30 = vector.shape_cast %29 : vector<1x1x128xf32> to vector<1x128xf32>
    %31 = vector.shape_cast %27 : vector<1x128xf32> to vector<1x1x128xf32>
    tpu.vector_store %arg10[%28, %c0_22, %c0_23], %31 {strides = array<i32>} : memref<1x1x128xf32, #tpu.memory_space<vmem>>, vector<1x1x128xf32>,
    %c1_i32 = arith.constant 1 : i32
    return
  }
  func.func @transform_0(%arg0: i32) -> (i32, i32, i32) {
    %c0_i32 = arith.constant 0 : i32
    %c0_i32_0 = arith.constant 0 : i32
    %c0_i32_1 = arith.constant 0 : i32
    return %arg0, %c0_i32, %c0_i32_0 : i32, i32, i32
  }
  func.func @transform_1(%arg0: i32) -> (i32, i32, i32) {
    %c0_i32 = arith.constant 0 : i32
    %c0_i32_0 = arith.constant 0 : i32
    %c0_i32_1 = arith.constant 0 : i32
    return %arg0, %c0_i32, %c0_i32_0 : i32, i32, i32
  }
  func.func @transform_2(%arg0: i32) -> (i32, i32) {
    %c0_i32 = arith.constant 0 : i32
    %c0_i32_0 = arith.constant 0 : i32
    %c0_i32_1 = arith.constant 0 : i32
    return %c0_i32, %c0_i32_0 : i32, i32
  }
  func.func @transform_3(%arg0: i32) -> (i32, i32) {
    %c0_i32 = arith.constant 0 : i32
    %c0_i32_0 = arith.constant 0 : i32
    %c0_i32_1 = arith.constant 0 : i32
    return %c0_i32, %c0_i32_0 : i32, i32
  }
  func.func @transform_4(%arg0: i32) -> (i32, i32) {
    %c0_i32 = arith.constant 0 : i32
    %c0_i32_0 = arith.constant 0 : i32
    %c0_i32_1 = arith.constant 0 : i32
    return %c0_i32, %c0_i32_0 : i32, i32
  }
  func.func @transform_5(%arg0: i32) -> (i32, i32) {
    %c0_i32 = arith.constant 0 : i32
    %c0_i32_0 = arith.constant 0 : i32
    %c0_i32_1 = arith.constant 0 : i32
    return %c0_i32, %c0_i32_0 : i32, i32
  }
  func.func @transform_6(%arg0: i32) -> (i32, i32) {
    %c0_i32 = arith.constant 0 : i32
    %c0_i32_0 = arith.constant 0 : i32
    %c0_i32_1 = arith.constant 0 : i32
    return %c0_i32, %c0_i32_0 : i32, i32
  }
  func.func @transform_7(%arg0: i32) -> (i32, i32) {
    %c0_i32 = arith.constant 0 : i32
    %c0_i32_0 = arith.constant 0 : i32
    %c0_i32_1 = arith.constant 0 : i32
    return %c0_i32, %c0_i32_0 : i32, i32
  }
  func.func @transform_8(%arg0: i32) -> (i32, i32) {
    %c0_i32 = arith.constant 0 : i32
    %c0_i32_0 = arith.constant 0 : i32
    %c0_i32_1 = arith.constant 0 : i32
    return %c0_i32, %c0_i32_0 : i32, i32
  }
  func.func @transform_9(%arg0: i32) -> (i32, i32, i32) {
    %c0_i32 = arith.constant 0 : i32
    %c0_i32_0 = arith.constant 0 : i32
    %c0_i32_1 = arith.constant 0 : i32
    return %arg0, %c0_i32, %c0_i32_0 : i32, i32, i32
  }
}

</mosaic_0001>

<bundles_post_ra>
// kernel: critic_forward.1
= control target key start
LH: loop header
LB: loop body
LE: loop exit
PB: predicated region body
PF: predicated region fallthrough
CT: control target
= control target key end

     0   :  { %vm125_vm0 = vcmask 1043456   ;;  %vm76_vm1 = vcmask 31744   ;;  %vm194_vm2 = vcmask 64512   ;;  %vm346_vm3 = vcmask 261120   ;;  %s897_s3 = inlined_call_operand.vmem [shape: f32[4,32], index: 3, kind: input, shape index: {}]   ;;  %s898_s2 = inlined_call_operand.vmem [shape: f32[8,32], index: 2, kind: input, shape index: {}]   ;;  %s899_s1 = inlined_call_operand.vmem [shape: f32[1,128,4], index: 1, kind: input, shape index: {}]   ;;  %s900_s0 = inlined_call_operand.vmem [shape: f32[1,128,8], index: 0, kind: input, shape index: {}]   ;;  %s901_s4 = inlined_call_operand.vmem [shape: f32[1,32], index: 4, kind: input, shape index: {}]   ;;  %s902_s5 = inlined_call_operand.vmem [shape: f32[32,32], index: 5, kind: input, shape index: {}]   ;;  %s903_s6 = inlined_call_operand.vmem [shape: f32[1,32], index: 6, kind: input, shape index: {}]   ;;  %s904_s8 = inlined_call_operand.<no memory space> [shape: f32[1,1], index: 8, kind: input, shape index: {}]   ;;  %s905_s7 = inlined_call_operand.vmem [shape: f32[1,32], index: 7, kind: input, shape index: {}]   ;;  %s906_s9 = inlined_call_operand.vmem [shape: f32[1,1,128], index: 9, kind: output, shape index: {}]  }
   0x1   :  { %v35_v0 = vld [vmem:[%s897_s3] sm:$0xf]  ;;  %v61_v4 = vld [vmem:[%s899_s1 + $0x8] sm:$0xff]  ;;  %v62_v6 = vld [vmem:[%s899_s1 + $0x10] sm:$0xff] }
   0x2   :  { %v34_v1 = vld [vmem:[%s898_s2] sm:$0xff]  ;;  %558 = vmatpush.msk.msra.mxu0 %vm125_vm0, %v35_v0  ;;  %v45_v5 = vld [vmem:[%s900_s0 + $0x8] sm:$0xff]  ;;  %v46_v7 = vld [vmem:[%s900_s0 + $0x10] sm:$0xff] }
   0x3   :  { %v60_v2 = vld [vmem:[%s899_s1] sm:$0xff]  ;;  %258 = vmatpush.msra.mxu1 %v34_v1  ;;  %v63_v8 = vld [vmem:[%s899_s1 + $0x18] sm:$0xff]  ;;  %v65_v12 = vld [vmem:[%s899_s1 + $0x28] sm:$0xff] }
   0x4   :  { %v44_v3 = vld [vmem:[%s900_s0] sm:$0xff]  ;;  %559 = vmatmul.msk.f32.vlgmr.msra.gmra.mxu0 %vm76_vm1, %v60_v2  ;;  %v47_v9 = vld [vmem:[%s900_s0 + $0x18] sm:$0xff]  ;;  %v49_v13 = vld [vmem:[%s900_s0 + $0x28] sm:$0xff] }
   0x5   :  { %575 = vmatmul.msk.f32.vlgmr.msra.gmra.mxu1 %vm194_vm2, %v44_v3  ;;  %v64_v10 = vld [vmem:[%s899_s1 + $0x20] sm:$0xff]  ;;  %v66_v14 = vld [vmem:[%s899_s1 + $0x30] sm:$0xff]  ;;  %v67_v16 = vld [vmem:[%s899_s1 + $0x38] sm:$0xff] }
   0x6   :  { %v48_v11 = vld [vmem:[%s900_s0 + $0x20] sm:$0xff]  ;;  %v50_v15 = vld [vmem:[%s900_s0 + $0x30] sm:$0xff]  ;;  %v51_v17 = vld [vmem:[%s900_s0 + $0x38] sm:$0xff] }
   0x7   :  { %v68_v18 = vld [vmem:[%s899_s1 + $0x40] sm:$0xff]  ;;  %v69_v20 = vld [vmem:[%s899_s1 + $0x48] sm:$0xff]  ;;  %v70_v22 = vld [vmem:[%s899_s1 + $0x50] sm:$0xff] }
   0x8   :  { %v52_v19 = vld [vmem:[%s900_s0 + $0x40] sm:$0xff]  ;;  %v53_v21 = vld [vmem:[%s900_s0 + $0x48] sm:$0xff]  ;;  %v54_v23 = vld [vmem:[%s900_s0 + $0x50] sm:$0xff] }
   0x9   :  { %v71_v24 = vld [vmem:[%s899_s1 + $0x58] sm:$0xff]  ;;  %v72_v27 = vld [vmem:[%s899_s1 + $0x60] sm:$0xff]  ;;  %v39_v29 = vld [vmem:[%s902_s5 + $0x10] sm:$0xff] }
   0xa   :  { %v55_v25 = vld [vmem:[%s900_s0 + $0x58] sm:$0xff]  ;;  %v56_v28 = vld [vmem:[%s900_s0 + $0x60] sm:$0xff]  ;;  %v38_v30 = vld [vmem:[%s902_s5 + $0x8] sm:$0xff] }
   0xb   :  { %v40_v26 = vld [vmem:[%s902_s5 + $0x18] sm:$0xff]  ;;  %v37_v31 = vld [vmem:[%s902_s5] sm:$0xff]  ;;  %v73_v32 = vld [vmem:[%s899_s1 + $0x68] sm:$0xff] }
   0xc   :  { %560 = vmatmul.msk.f32.gmra.mxu0 %vm76_vm1, %v61_v4  ;;  %407 = vmatpush.msra.mxu2 %v40_v26  ;;  %v57_v33 = vld [vmem:[%s900_s0 + $0x68] sm:$0xff]  ;;  %v74_v34 = vld [vmem:[%s899_s1 + $0x70] sm:$0xff]  ;;  %v75_v36 = vld [vmem:[%s899_s1 + $0x78] sm:$0xff] }
   0xd   :  { %576 = vmatmul.msk.f32.gmra.mxu1 %vm194_vm2, %v45_v5  ;;  %v58_v35 = vld [vmem:[%s900_s0 + $0x70] sm:$0xff]  ;;  %v59_v37 = vld [vmem:[%s900_s0 + $0x78] sm:$0xff]  ;;  %v828_v38 = vld [vmem:[%s901_s4] ss:$0 sm:$0xff] }
   0xe   :  { %408 = vmatpush.msra.mxu2 %v39_v29 }
  0x10   :  { %409 = vmatpush.msra.mxu2 %v38_v30 }
  0x12   :  { %410 = vmatpush.msra.mxu2 %v37_v31 }
  0x14   :  { %561 = vmatmul.msk.f32.gmra.mxu0 %vm76_vm1, %v62_v6 }
  0x15   :  { %577 = vmatmul.msk.f32.gmra.mxu1 %vm194_vm2, %v46_v7 }
  0x1c   :  { %562 = vmatmul.msk.f32.gmra.mxu0 %vm76_vm1, %v63_v8 }
  0x1d   :  { %578 = vmatmul.msk.f32.gmra.mxu1 %vm194_vm2, %v47_v9 }
  0x24   :  { %563 = vmatmul.msk.f32.gmra.mxu0 %vm76_vm1, %v64_v10 }
  0x25   :  { %579 = vmatmul.msk.f32.gmra.mxu1 %vm194_vm2, %v48_v11 }
  0x2c   :  { %564 = vmatmul.msk.f32.gmra.mxu0 %vm76_vm1, %v65_v12 }
  0x2d   :  { %580 = vmatmul.msk.f32.gmra.mxu1 %vm194_vm2, %v49_v13 }
  0x34   :  { %565 = vmatmul.msk.f32.gmra.mxu0 %vm76_vm1, %v66_v14 }
  0x35   :  { %581 = vmatmul.msk.f32.gmra.mxu1 %vm194_vm2, %v50_v15 }
  0x3c   :  { %566 = vmatmul.msk.f32.gmra.mxu0 %vm76_vm1, %v67_v16 }
  0x3d   :  { %582 = vmatmul.msk.f32.gmra.mxu1 %vm194_vm2, %v51_v17 }
  0x44   :  { %567 = vmatmul.msk.f32.gmra.mxu0 %vm76_vm1, %v68_v18 }
  0x45   :  { %583 = vmatmul.msk.f32.gmra.mxu1 %vm194_vm2, %v52_v19 }
  0x4c   :  { %568 = vmatmul.msk.f32.gmra.mxu0 %vm76_vm1, %v69_v20 }
  0x4d   :  { %584 = vmatmul.msk.f32.gmra.mxu1 %vm194_vm2, %v53_v21 }
  0x54   :  { %569 = vmatmul.msk.f32.gmra.mxu0 %vm76_vm1, %v70_v22 }
  0x55   :  { %585 = vmatmul.msk.f32.gmra.mxu1 %vm194_vm2, %v54_v23 }
  0x5c   :  { %570 = vmatmul.msk.f32.gmra.mxu0 %vm76_vm1, %v71_v24 }
  0x5d   :  { %586 = vmatmul.msk.f32.gmra.mxu1 %vm194_vm2, %v55_v25 }
  0x64   :  { %571 = vmatmul.msk.f32.gmra.mxu0 %vm76_vm1, %v72_v27 }
  0x65   :  { %587 = vmatmul.msk.f32.gmra.mxu1 %vm194_vm2, %v56_v28 }
  0x6c   :  { %572 = vmatmul.msk.f32.gmra.mxu0 %vm76_vm1, %v73_v32 }
  0x6d   :  { %588 = vmatmul.msk.f32.gmra.mxu1 %vm194_vm2, %v57_v33 }
  0x74   :  { %573 = vmatmul.msk.f32.gmra.mxu0 %vm76_vm1, %v74_v34 }
  0x75   :  { %589 = vmatmul.msk.f32.gmra.mxu1 %vm194_vm2, %v58_v35 }
  0x7c   :  { %574 = vmatmul.msk.f32.gmra.mxu0 %vm76_vm1, %v75_v36 }
  0x7d   :  { %590 = vmatmul.msk.f32.gmra.mxu1 %vm194_vm2, %v59_v37 }
  0x81   :  { %v146_v39 = vpop.f32.mrf.mxu0 }
  0x82   :  { %v260_v40 = vpop.f32.mrf.mxu1 }
  0x83   :  { %v261_v41 = vadd.f32 %v260_v40, %v146_v39 }
  0x85   :  { %v311_v42 = vadd.f32 %v828_v38, %v261_v41 }
  0x87   :  { %v327_v43 = vmax.f32 %v311_v42, 0.0 }
  0x89   :  { %591 = vmatmul.msk.f32.vlgmr.msra.gmra.mxu2 %vm346_vm3, %v327_v43  ;;  %v149_v44 = vpop.f32.mrf.mxu0 }
  0x8a   :  { %v263_v45 = vpop.f32.mrf.mxu1 }
  0x8b   :  { %v264_v46 = vadd.f32 %v263_v45, %v149_v44 }
  0x8d   :  { %v312_v47 = vadd.f32 %v828_v38, %v264_v46 }
  0x8f   :  { %v328_v48 = vmax.f32 %v312_v47, 0.0 }
  0x91   :  { %592 = vmatmul.msk.f32.gmra.mxu2 %vm346_vm3, %v328_v48  ;;  %v152_v49 = vpop.f32.mrf.mxu0 }
  0x92   :  { %v266_v50 = vpop.f32.mrf.mxu1 }
  0x93   :  { %v267_v51 = vadd.f32 %v266_v50, %v152_v49 }
  0x95   :  { %v313_v52 = vadd.f32 %v828_v38, %v267_v51 }
  0x97   :  { %v329_v53 = vmax.f32 %v313_v52, 0.0 }
  0x99   :  { %593 = vmatmul.msk.f32.gmra.mxu2 %vm346_vm3, %v329_v53  ;;  %v155_v54 = vpop.f32.mrf.mxu0 }
  0x9a   :  { %v269_v55 = vpop.f32.mrf.mxu1 }
  0x9b   :  { %v270_v56 = vadd.f32 %v269_v55, %v155_v54 }
  0x9d   :  { %v314_v57 = vadd.f32 %v828_v38, %v270_v56 }
  0x9f   :  { %v330_v58 = vmax.f32 %v314_v57, 0.0 }
  0xa1   :  { %594 = vmatmul.msk.f32.gmra.mxu2 %vm346_vm3, %v330_v58  ;;  %v158_v59 = vpop.f32.mrf.mxu0 }
  0xa2   :  { %v272_v60 = vpop.f32.mrf.mxu1 }
  0xa3   :  { %v273_v61 = vadd.f32 %v272_v60, %v158_v59 }
  0xa5   :  { %v315_v62 = vadd.f32 %v828_v38, %v273_v61 }
  0xa7   :  { %v331_v63 = vmax.f32 %v315_v62, 0.0 }
  0xa9   :  { %595 = vmatmul.msk.f32.gmra.mxu2 %vm346_vm3, %v331_v63  ;;  %v161_v0 = vpop.f32.mrf.mxu0 }
  0xaa   :  { %v275_v1 = vpop.f32.mrf.mxu1 }
  0xab   :  { %v276_v2 = vadd.f32 %v275_v1, %v161_v0 }
  0xad   :  { %v316_v3 = vadd.f32 %v828_v38, %v276_v2 }
  0xaf   :  { %v332_v4 = vmax.f32 %v316_v3, 0.0 }
  0xb1   :  { %596 = vmatmul.msk.f32.gmra.mxu2 %vm346_vm3, %v332_v4  ;;  %v164_v5 = vpop.f32.mrf.mxu0 }
  0xb2   :  { %v278_v6 = vpop.f32.mrf.mxu1 }
  0xb3   :  { %v279_v7 = vadd.f32 %v278_v6, %v164_v5  ;;  %v627_v6 = vld [vmem:[%s903_s6] ss:$0 sm:$0xff] }
  0xb5   :  { %v317_v8 = vadd.f32 %v828_v38, %v279_v7 }
  0xb7   :  { %v333_v9 = vmax.f32 %v317_v8, 0.0 }
  0xb9   :  { %597 = vmatmul.msk.f32.gmra.mxu2 %vm346_vm3, %v333_v9  ;;  %v167_v10 = vpop.f32.mrf.mxu0 }
  0xba   :  { %v281_v11 = vpop.f32.mrf.mxu1 }
  0xbb   :  { %v282_v12 = vadd.f32 %v281_v11, %v167_v10 }
  0xbd   :  { %v318_v13 = vadd.f32 %v828_v38, %v282_v12 }
  0xbf   :  { %v334_v14 = vmax.f32 %v318_v13, 0.0 }
  0xc1   :  { %598 = vmatmul.msk.f32.gmra.mxu2 %vm346_vm3, %v334_v14  ;;  %v170_v15 = vpop.f32.mrf.mxu0 }
  0xc2   :  { %v284_v16 = vpop.f32.mrf.mxu1 }
  0xc3   :  { %v285_v17 = vadd.f32 %v284_v16, %v170_v15 }
  0xc5   :  { %v319_v18 = vadd.f32 %v828_v38, %v285_v17 }
  0xc7   :  { %v335_v19 = vmax.f32 %v319_v18, 0.0 }
  0xc9   :  { %599 = vmatmul.msk.f32.gmra.mxu2 %vm346_vm3, %v335_v19  ;;  %v173_v20 = vpop.f32.mrf.mxu0 }
  0xca   :  { %v287_v21 = vpop.f32.mrf.mxu1 }
  0xcb   :  { %v288_v22 = vadd.f32 %v287_v21, %v173_v20 }
  0xcd   :  { %v320_v23 = vadd.f32 %v828_v38, %v288_v22 }
  0xcf   :  { %v336_v24 = vmax.f32 %v320_v23, 0.0 }
  0xd1   :  { %600 = vmatmul.msk.f32.gmra.mxu2 %vm346_vm3, %v336_v24  ;;  %v176_v25 = vpop.f32.mrf.mxu0 }
  0xd2   :  { %v290_v26 = vpop.f32.mrf.mxu1 }
  0xd3   :  { %v291_v27 = vadd.f32 %v290_v26, %v176_v25 }
  0xd5   :  { %v321_v28 = vadd.f32 %v828_v38, %v291_v27  ;;  %v14_v27 = vstv %s904_s8 }
  0xd6   :  { %15 = vst [vmem:[#allocation2] sm:$0x1] %v14_v27 }
  0xd7   :  { %v337_v29 = vmax.f32 %v321_v28, 0.0  ;;  %v628_v28 = vmov 0  }
  0xd8   :  { %625 = vset.pattern.permute.xlu0 %v628_v28 }
  0xd9   :  { %601 = vmatmul.msk.f32.gmra.mxu2 %vm346_vm3, %v337_v29  ;;  %v179_v30 = vpop.f32.mrf.mxu0 }
  0xda   :  { %v293_v31 = vpop.f32.mrf.mxu1 }
  0xdb   :  { %v294_v32 = vadd.f32 %v293_v31, %v179_v30 }
  0xdd   :  { %v322_v33 = vadd.f32 %v828_v38, %v294_v32 }
  0xdf   :  { %v338_v34 = vmax.f32 %v322_v33, 0.0  ;;  %v43_v33 = vld [vmem:[#allocation2] sm:$0x1] }
  0xe0   :  { %478 = vperm.xlu0 %625, %v43_v33  }
  0xe1   :  { %602 = vmatmul.msk.f32.gmra.mxu2 %vm346_vm3, %v338_v34  ;;  %v182_v35 = vpop.f32.mrf.mxu0 }
  0xe2   :  { %v296_v36 = vpop.f32.mrf.mxu1 }
  0xe3   :  { %v297_v37 = vadd.f32 %v296_v36, %v182_v35 }
  0xe5   :  { %v323_v39 = vadd.f32 %v828_v38, %v297_v37 }
  0xe7   :  { %v339_v40 = vmax.f32 %v323_v39, 0.0 }
  0xe9   :  { %603 = vmatmul.msk.f32.gmra.mxu2 %vm346_vm3, %v339_v40  ;;  %v185_v41 = vpop.f32.mrf.mxu0 }
  0xea   :  { %v299_v42 = vpop.f32.mrf.mxu1 }
  0xeb   :  { %v300_v43 = vadd.f32 %v299_v42, %v185_v41 }
  0xed   :  { %v324_v44 = vadd.f32 %v828_v38, %v300_v43 }
  0xef   :  { %v340_v45 = vmax.f32 %v324_v44, 0.0  ;;  %v42_v44 = vld [vmem:[%s905_s7] sm:$0x1] }
  0xf1   :  { %604 = vmatmul.msk.f32.gmra.mxu2 %vm346_vm3, %v340_v45  ;;  %v188_v46 = vpop.f32.mrf.mxu0 }
  0xf2   :  { %v302_v47 = vpop.f32.mrf.mxu1 }
  0xf3   :  { %v303_v48 = vadd.f32 %v302_v47, %v188_v46 }
  0xf5   :  { %v325_v49 = vadd.f32 %v828_v38, %v303_v48 }
  0xf7   :  { %v341_v50 = vmax.f32 %v325_v49, 0.0 }
  0xf9   :  { %605 = vmatmul.msk.f32.gmra.mxu2 %vm346_vm3, %v341_v50  ;;  %v191_v51 = vpop.f32.mrf.mxu0 }
  0xfa   :  { %v305_v52 = vpop.f32.mrf.mxu1 }
  0xfb   :  { %v306_v53 = vadd.f32 %v305_v52, %v191_v51 }
  0xfd   :  { %v326_v54 = vadd.f32 %v828_v38, %v306_v53 }
  0xff   :  { %v342_v55 = vmax.f32 %v326_v54, 0.0 }
 0x101   :  { %606 = vmatmul.msk.f32.gmra.mxu2 %vm346_vm3, %v342_v55 }
 0x10c   :  { %v862_v56 = vpop.f32.mrf.mxu2 }
 0x10d   :  { %v413_v41 = vadd.f32 %v627_v6, %v862_v56 }
 0x10f   :  { %v460_v43 = vmax.f32 %v413_v41, 0.0 }
 0x114   :  { %v864_v57 = vpop.f32.mrf.mxu2 }
 0x115   :  { %v416_v39 = vadd.f32 %v627_v6, %v864_v57 }
 0x117   :  { %v461_v42 = vmax.f32 %v416_v39, 0.0 }
 0x11c   :  { %v418_v58 = vpop.f32.mrf.mxu2 }
 0x11d   :  { %v419_v36 = vadd.f32 %v627_v6, %v418_v58 }
 0x11f   :  { %v462_v40 = vmax.f32 %v419_v36, 0.0 }
 0x124   :  { %v421_v59 = vpop.f32.mrf.mxu2 }
 0x125   :  { %v422_v34 = vadd.f32 %v627_v6, %v421_v59 }
 0x127   :  { %v463_v37 = vmax.f32 %v422_v34, 0.0 }
 0x12c   :  { %v424_v60 = vpop.f32.mrf.mxu2 }
 0x12d   :  { %v425_v31 = vadd.f32 %v627_v6, %v424_v60 }
 0x12f   :  { %v464_v35 = vmax.f32 %v425_v31, 0.0 }
 0x134   :  { %v427_v61 = vpop.f32.mrf.mxu2 }
 0x135   :  { %v428_v29 = vadd.f32 %v627_v6, %v427_v61 }
 0x137   :  { %v465_v32 = vmax.f32 %v428_v29, 0.0 }
 0x13c   :  { %v430_v62 = vpop.f32.mrf.mxu2 }
 0x13d   :  { %v431_v25 = vadd.f32 %v627_v6, %v430_v62 }
 0x13f   :  { %v466_v30 = vmax.f32 %v431_v25, 0.0 }
 0x144   :  { %v433_v63 = vpop.f32.mrf.mxu2 }
 0x145   :  { %v434_v23 = vadd.f32 %v627_v6, %v433_v63 }
 0x147   :  { %v467_v26 = vmax.f32 %v434_v23, 0.0 }
 0x14c   :  { %v436_v0 = vpop.f32.mrf.mxu2 }
 0x14d   :  { %v437_v21 = vadd.f32 %v627_v6, %v436_v0 }
 0x14f   :  { %v468_v24 = vmax.f32 %v437_v21, 0.0 }
 0x152   :  { %v479_v45 = vpop.permute.xlu0 %478 }
 0x153   :  { %v481_v46 = vperm.slane %v479_v45, 0 }
 0x154   :  { %v439_v1 = vpop.f32.mrf.mxu2 }
 0x155   :  { %v440_v19 = vadd.f32 %v627_v6, %v439_v1 }
 0x157   :  { %v469_v22 = vmax.f32 %v440_v19, 0.0 }
 0x15c   :  { %v442_v2 = vpop.f32.mrf.mxu2 }
 0x15d   :  { %v443_v17 = vadd.f32 %v627_v6, %v442_v2 }
 0x15f   :  { %v470_v20 = vmax.f32 %v443_v17, 0.0 }
 0x164   :  { %v445_v3 = vpop.f32.mrf.mxu2 }
 0x165   :  { %v446_v15 = vadd.f32 %v627_v6, %v445_v3 }
 0x167   :  { %v471_v18 = vmax.f32 %v446_v15, 0.0 }
 0x16c   :  { %v448_v4 = vpop.f32.mrf.mxu2 }
 0x16d   :  { %v449_v13 = vadd.f32 %v627_v6, %v448_v4 }
 0x16f   :  { %v472_v16 = vmax.f32 %v449_v13, 0.0 }
 0x174   :  { %v451_v5 = vpop.f32.mrf.mxu2 }
 0x175   :  { %v452_v11 = vadd.f32 %v627_v6, %v451_v5 }
 0x177   :  { %v473_v14 = vmax.f32 %v452_v11, 0.0 }
 0x17c   :  { %v454_v38 = vpop.f32.mrf.mxu2 }
 0x17d   :  { %v455_v9 = vadd.f32 %v627_v6, %v454_v38 }
 0x17f   :  { %v474_v12 = vmax.f32 %v455_v9, 0.0 }
 0x184   :  { %v457_v7 = vpop.f32.mrf.mxu2 }
 0x185   :  { %v458_v8 = vadd.f32 %v627_v6, %v457_v7 }
 0x187   :  { %v475_v10 = vmax.f32 %v458_v8, 0.0 }
 0x189   :  { %607 = vmatpush.xpose.msk.msra.mxu3 %vm346_vm3, %v475_v10 }
 0x18d   :  { %608 = vmatpush.xpose.msk.msra.mxu3 %vm346_vm3, %v474_v12 }
 0x191   :  { %609 = vmatpush.xpose.msk.msra.mxu3 %vm346_vm3, %v473_v14 }
 0x195   :  { %610 = vmatpush.xpose.msk.msra.mxu3 %vm346_vm3, %v472_v16 }
 0x199   :  { %611 = vmatpush.xpose.msk.msra.mxu3 %vm346_vm3, %v471_v18 }
 0x19d   :  { %612 = vmatpush.xpose.msk.msra.mxu3 %vm346_vm3, %v470_v20 }
 0x1a1   :  { %613 = vmatpush.xpose.msk.msra.mxu3 %vm346_vm3, %v469_v22 }
 0x1a5   :  { %614 = vmatpush.xpose.msk.msra.mxu3 %vm346_vm3, %v468_v24 }
 0x1a9   :  { %615 = vmatpush.xpose.msk.msra.mxu3 %vm346_vm3, %v467_v26 }
 0x1ad   :  { %616 = vmatpush.xpose.msk.msra.mxu3 %vm346_vm3, %v466_v30 }
 0x1b1   :  { %617 = vmatpush.xpose.msk.msra.mxu3 %vm346_vm3, %v465_v32 }
 0x1b5   :  { %618 = vmatpush.xpose.msk.msra.mxu3 %vm346_vm3, %v464_v35 }
 0x1b9   :  { %619 = vmatpush.xpose.msk.msra.mxu3 %vm346_vm3, %v463_v37 }
 0x1bd   :  { %620 = vmatpush.xpose.msk.msra.mxu3 %vm346_vm3, %v462_v40 }
 0x1c1   :  { %621 = vmatpush.xpose.msk.msra.mxu3 %vm346_vm3, %v461_v42 }
 0x1c5   :  { %622 = vmatpush.xpose.msk.msra.mxu3 %vm346_vm3, %v460_v43 }
 0x1c8   :  { %623 = vmatmul.msk.f32.vlgmr.msra.gmra.mxu3 %vm346_vm3, %v42_v44 }
 0x24b   :  { %v550_v47 = vpop.f32.mrf.mxu3 }
 0x24c   :  { %v551_v48 = vadd.f32 %v550_v47, %v481_v46 }
 0x24e   :  { %553 = vst [vmem:[%s906_s9] sm:$0x1] %v551_v48 }

</bundles_post_ra>
